<compile_context>
chip_gen: v6e
topology: v6e:2x2x1
jax: 0.10.0
libtpu: 0.0.40
codegen_flags: <defaults>
</compile_context>

<pallas_src>
import functools

import jax
import jax.numpy as jnp
from jax.experimental import pallas as pl
from jax.experimental.pallas import tpu as pltpu


def _round_up(x, m):
    return (x + m - 1) // m * m


def _categorical_kernel(has_mask, *refs):
    if has_mask:
        x_ref, wt_ref, b_ref, pen_ref, logits_ref, probs_ref = refs
    else:
        x_ref, wt_ref, b_ref, logits_ref, probs_ref = refs
        pen_ref = None

    # z = x @ W_t + b.  bf16 operands, f32 accumulation on the MXU.
    z = jnp.dot(x_ref[...], wt_ref[...], preferred_element_type=jnp.float32)
    z = z + b_ref[...]                      # bias is already f32 (1, N): plain VPU add

    if has_mask:
        # Additive penalty (-1e10 where unavailable, 0 elsewhere), precomputed in the wrapper.
        # Single VPU upcast+add; no int8 relayout / compare / select in the grid body.
        z = z + pen_ref[...].astype(jnp.float32)

    # Categorical(logits=z): normalized logits + probs via a numerically stable softmax.
    m = jnp.max(z, axis=-1, keepdims=True)
    lse = m + jnp.log(jnp.sum(jnp.exp(z - m), axis=-1, keepdims=True))
    logits = z - lse
    logits_ref[...] = logits
    probs_ref[...] = jnp.exp(logits)        # EUP slot; reuses the normalized logits


def prepare_params(weight, bias, compute_dtype=jnp.bfloat16):
    """One-time parameter prep (call at init, outside the hot path).

    weight: (num_outputs, num_inputs) torch nn.Linear layout.
    bias:   (num_outputs,) or (1, num_outputs).
    Returns (weight_t, bias) with weight_t (num_inputs, num_outputs) in compute_dtype
    (canonical MXU layout, no per-tile transpose) and bias (1, num_outputs) f32.
    """
    num_outputs = weight.shape[0]
    weight_t = jnp.asarray(weight, compute_dtype).T
    bias = jnp.asarray(bias, jnp.float32).reshape(1, num_outputs)
    return weight_t, bias


def _vmem_limit_bytes(tb, k, n, has_mask, compute_dtype):
    lane = 128
    kp = _round_up(k, lane)
    np_ = _round_up(n, lane)
    bpe = jnp.dtype(compute_dtype).itemsize
    per_row = 2 * (bpe * kp                              # x tile, double-buffered
                   + (bpe * np_ if has_mask else 0)      # penalty tile, double-buffered
                   + 2 * 4 * np_)                        # logits + probs (f32), double-buffered
    per_row += 3 * 4 * np_                               # in-body f32 temporaries (z, exp, ...)
    fixed = bpe * kp * np_ + 4 * np_ + (1 << 20)         # resident W_t + b + slack
    est = tb * per_row + fixed
    # Floor at 32 MiB (raises v5e's 16 MiB default scoped limit), cap at 48 MiB (< v7x's 64 MiB).
    return int(min(max(est, 32 << 20), 48 << 20))


def categorical_forward(x, weight_t, bias, available_actions=None, *,
                        max_block_rows=4096, small_batch_threshold=256,
                        force_pallas=False, compute_dtype=jnp.bfloat16):
    """Forward pass of the Categorical actor head.

    x:        (B, num_inputs)
    weight_t: (num_inputs, num_outputs)  -- pre-transposed via prepare_params
    bias:     (1, num_outputs) float32   -- via prepare_params
    available_actions: optional (B, num_outputs) int/bool mask, 0 == unavailable

    Returns (logits, probs), each (B, num_outputs) float32, matching
    torch.distributions.Categorical(logits=...).logits / .probs.
    """
    B, num_inputs = x.shape
    num_outputs = weight_t.shape[1]
    has_mask = available_actions is not None

    x_c = x.astype(compute_dtype)
    penalty = None
    if has_mask:
        # Precompute the mask as an additive penalty (compute_dtype, typically bf16:
        # only 2*N bytes/row of extra HBM traffic, and the kernel does a single add).
        penalty = jnp.where(available_actions == 0,
                            jnp.float32(-1e10), jnp.float32(0.0)).astype(compute_dtype)

    # Small-batch fallback: kernel launch + pipeline prologue dominates at tiny B.
    if B < small_batch_threshold and not force_pallas:
        z = jnp.dot(x_c, weight_t, preferred_element_type=jnp.float32) + bias
        if has_mask:
            z = z + penalty.astype(jnp.float32)
        logits = z - jax.scipy.special.logsumexp(z, axis=-1, keepdims=True)
        return logits, jnp.exp(logits)

    # Batch tile: large enough to amortize the ~0.35 us/step pipeline overhead, but always
    # yielding >=2 grid tiles so v7x's two TensorCores both get work.  Multiple of 32 keeps
    # sublane tiling legal for bf16/int8 blocks.
    tb = min(max_block_rows, _round_up(pl.cdiv(B, 2), 32))
    grid = (pl.cdiv(B, tb),)

    in_specs = [
        pl.BlockSpec((tb, num_inputs), lambda i: (i, 0)),            # x: streamed per tile
        pl.BlockSpec((num_inputs, num_outputs), lambda i: (0, 0)),   # W_t: VMEM-resident
        pl.BlockSpec((1, num_outputs), lambda i: (0, 0)),            # b: VMEM-resident
    ]
    operands = [x_c, weight_t, bias]
    if has_mask:
        in_specs.append(pl.BlockSpec((tb, num_outputs), lambda i: (i, 0)))
        operands.append(penalty)

    logits, probs = pl.pallas_call(
        functools.partial(_categorical_kernel, has_mask),
        grid=grid,
        in_specs=in_specs,
        out_specs=(
            pl.BlockSpec((tb, num_outputs), lambda i: (i, 0)),
            pl.BlockSpec((tb, num_outputs), lambda i: (i, 0)),
        ),
        out_shape=(
            jax.ShapeDtypeStruct((B, num_outputs), jnp.float32),
            jax.ShapeDtypeStruct((B, num_outputs), jnp.float32),
        ),
        compiler_params=pltpu.CompilerParams(
            dimension_semantics=("parallel",),  # shard batch tiles across TCs (v7x megacore)
            vmem_limit_bytes=_vmem_limit_bytes(tb, num_inputs, num_outputs,
                                               has_mask, compute_dtype),
        ),
    )(*operands)

    return logits, probs


if __name__ == "__main__":
    key = jax.random.PRNGKey(0)
    k_x, k_w, k_mask = jax.random.split(key, 3)

    num_inputs, num_outputs = 32, 8
    gain = 0.01

    # Parameter init (once): orthogonal init (use_orthogonal=True, gain=0.01), bias = 0.
    weight = jax.nn.initializers.orthogonal(scale=gain)(
        k_w, (num_outputs, num_inputs), jnp.float32)
    bias0 = jnp.zeros((num_outputs,), dtype=jnp.float32)
    weight_t, bias = prepare_params(weight, bias0)   # one-time prep, outside the hot path

    # Batch large enough to exercise the Pallas path with >=2 tiles, still tiny overall.
    B = 512
    x = jax.random.normal(k_x, (B, num_inputs), dtype=jnp.float32)
    available_actions = (jax.random.uniform(k_mask, (B, num_outputs)) > 0.3).astype(jnp.int8)
    available_actions = available_actions.at[:, 0].set(1)   # >=1 available action per row

    logits, probs = categorical_forward(x, weight_t, bias, available_actions,
                                        force_pallas=True)
    jax.block_until_ready((logits, probs))

    # Reference with the same compute dtypes as the kernel (bf16 matmul inputs, bf16 penalty).
    xb = x.astype(jnp.bfloat16)
    pen_ref = jnp.where(available_actions == 0, jnp.float32(-1e10),
                        jnp.float32(0.0)).astype(jnp.bfloat16).astype(jnp.float32)
    z_ref = jnp.dot(xb, weight_t, preferred_element_type=jnp.float32) + bias + pen_ref
    logits_ref = z_ref - jax.scipy.special.logsumexp(z_ref, axis=-1, keepdims=True)
    probs_ref = jax.nn.softmax(z_ref, axis=-1)
    assert jnp.allclose(logits, logits_ref, atol=1e-4, rtol=1e-4), "logits mismatch"
    assert jnp.allclose(probs, probs_ref, atol=1e-5), "probs mismatch"

    # No-mask path through the kernel.
    logits2, probs2 = categorical_forward(x, weight_t, bias, None, force_pallas=True)
    jax.block_until_ready((logits2, probs2))
    z2 = jnp.dot(xb, weight_t, preferred_element_type=jnp.float32) + bias
    logits2_ref = z2 - jax.scipy.special.logsumexp(z2, axis=-1, keepdims=True)
    assert jnp.allclose(logits2, logits2_ref, atol=1e-4, rtol=1e-4), "no-mask logits mismatch"
    assert jnp.allclose(probs2, jax.nn.softmax(z2, axis=-1), atol=1e-5), "no-mask probs mismatch"

    # Small-batch fallback path (plain fused XLA expression, same semantics).
    x_small = x[:4]
    mask_small = available_actions[:4]
    logits3, probs3 = categorical_forward(x_small, weight_t, bias, mask_small)
    jax.block_until_ready((logits3, probs3))
    assert jnp.allclose(logits3, logits_ref[:4], atol=1e-4, rtol=1e-4), "fallback logits mismatch"
    assert jnp.allclose(probs3, probs_ref[:4], atol=1e-5), "fallback probs mismatch"

    print("KERNEL_OK")
</pallas_src>

<mosaic_0001>
module attributes {stable_mosaic.version = 11 : i64} {
  func.func @_categorical_kernel(%arg0: i32, %arg1: memref<256x32xbf16, #tpu.memory_space<vmem>>, %arg2: memref<32x8xbf16, #tpu.memory_space<vmem>>, %arg3: memref<1x8xf32, #tpu.memory_space<vmem>>, %arg4: memref<256x8xbf16, #tpu.memory_space<vmem>>, %arg5: memref<256x8xf32, #tpu.memory_space<vmem>>, %arg6: memref<256x8xf32, #tpu.memory_space<vmem>>) attributes {dimension_semantics = [#tpu.dimension_semantics<parallel>], iteration_bounds = array<i64: 2>, scalar_prefetch = 0 : i64, scratch_operands = 0 : i64, tpu.core_type = #tpu.core_type<tc>, window_params = [{transform_indices = @transform_0, window_bounds = array<i64: 256, 32>}, {pipeline_mode = #tpu.pipeline_mode<synchronous>, transform_indices = @transform_1, window_bounds = array<i64: 32, 8>}, {pipeline_mode = #tpu.pipeline_mode<synchronous>, transform_indices = @transform_2, window_bounds = array<i64: 1, 8>}, {transform_indices = @transform_3, window_bounds = array<i64: 256, 8>}, {transform_indices = @transform_4, window_bounds = array<i64: 256, 8>}, {transform_indices = @transform_5, window_bounds = array<i64: 256, 8>}]} {
    %c0 = arith.constant 0 : index
    %c0_0 = arith.constant 0 : index
    %0 = vector.load %arg1[%c0, %c0_0] : memref<256x32xbf16, #tpu.memory_space<vmem>>, vector<256x32xbf16>
    %c0_1 = arith.constant 0 : index
    %c0_2 = arith.constant 0 : index
    %1 = vector.load %arg2[%c0_1, %c0_2] : memref<32x8xbf16, #tpu.memory_space<vmem>>, vector<32x8xbf16>
    %cst = arith.constant dense<0.000000e+00> : vector<256x8xf32>
    %2 = tpu.matmul %0, %1, %cst {dimension_numbers = #tpu.dot_dimension_numbers<[1], [0], [0], [1], [0, 0, 1, 1], [], []>} : vector<256x32xbf16>, vector<32x8xbf16>, vector<256x8xf32> -> vector<256x8xf32>
    %c0_3 = arith.constant 0 : index
    %c0_4 = arith.constant 0 : index
    %3 = vector.load %arg3[%c0_3, %c0_4] : memref<1x8xf32, #tpu.memory_space<vmem>>, vector<1x8xf32>
    %4 = vector.broadcast %3 : vector<1x8xf32> to vector<256x8xf32>
    %5 = arith.addf %2, %4 : vector<256x8xf32>
    %c0_5 = arith.constant 0 : index
    %c0_6 = arith.constant 0 : index
    %6 = vector.load %arg4[%c0_5, %c0_6] : memref<256x8xbf16, #tpu.memory_space<vmem>>, vector<256x8xbf16>
    %7 = arith.extf %6 : vector<256x8xbf16> to vector<256x8xf32>
    %8 = arith.addf %5, %7 : vector<256x8xf32>
    %cst_7 = arith.constant dense<0xFF800000> : vector<256xf32>
    %9 = vector.multi_reduction <maximumf>, %8, %cst_7 [1] : vector<256x8xf32> to vector<256xf32>
    %10 = vector.shape_cast %9 : vector<256xf32> to vector<256x1xf32>
    %11 = vector.broadcast %10 : vector<256x1xf32> to vector<256x8xf32>
    %12 = arith.subf %8, %11 : vector<256x8xf32>
    %13 = math.exp %12 : vector<256x8xf32>
    %cst_8 = arith.constant dense<0.000000e+00> : vector<256xf32>
    %14 = vector.multi_reduction <add>, %13, %cst_8 [1] : vector<256x8xf32> to vector<256xf32>
    %15 = vector.shape_cast %14 : vector<256xf32> to vector<256x1xf32>
    %16 = math.log %15 : vector<256x1xf32>
    %17 = arith.addf %10, %16 : vector<256x1xf32>
    %18 = vector.broadcast %17 : vector<256x1xf32> to vector<256x8xf32>
    %19 = arith.subf %8, %18 : vector<256x8xf32>
    %c0_9 = arith.constant 0 : index
    %c0_10 = arith.constant 0 : index
    %20 = vector.load %arg5[%c0_9, %c0_10] : memref<256x8xf32, #tpu.memory_space<vmem>>, vector<256x8xf32>
    tpu.vector_store %arg5[%c0_9, %c0_10], %19 {strides = array<i32>} : memref<256x8xf32, #tpu.memory_space<vmem>>, vector<256x8xf32>,
    %21 = math.exp %19 : vector<256x8xf32>
    %c0_11 = arith.constant 0 : index
    %c0_12 = arith.constant 0 : index
    %22 = vector.load %arg6[%c0_11, %c0_12] : memref<256x8xf32, #tpu.memory_space<vmem>>, vector<256x8xf32>
    tpu.vector_store %arg6[%c0_11, %c0_12], %21 {strides = array<i32>} : memref<256x8xf32, #tpu.memory_space<vmem>>, vector<256x8xf32>,
    return
  }
  func.func @transform_0(%arg0: i32) -> (i32, i32) {
    %c0_i32 = arith.constant 0 : i32
    %c0_i32_0 = arith.constant 0 : i32
    return %arg0, %c0_i32 : i32, i32
  }
  func.func @transform_1(%arg0: i32) -> (i32, i32) {
    %c0_i32 = arith.constant 0 : i32
    %c0_i32_0 = arith.constant 0 : i32
    %c0_i32_1 = arith.constant 0 : i32
    return %c0_i32, %c0_i32_0 : i32, i32
  }
  func.func @transform_2(%arg0: i32) -> (i32, i32) {
    %c0_i32 = arith.constant 0 : i32
    %c0_i32_0 = arith.constant 0 : i32
    %c0_i32_1 = arith.constant 0 : i32
    return %c0_i32, %c0_i32_0 : i32, i32
  }
  func.func @transform_3(%arg0: i32) -> (i32, i32) {
    %c0_i32 = arith.constant 0 : i32
    %c0_i32_0 = arith.constant 0 : i32
    return %arg0, %c0_i32 : i32, i32
  }
  func.func @transform_4(%arg0: i32) -> (i32, i32) {
    %c0_i32 = arith.constant 0 : i32
    %c0_i32_0 = arith.constant 0 : i32
    return %arg0, %c0_i32 : i32, i32
  }
  func.func @transform_5(%arg0: i32) -> (i32, i32) {
    %c0_i32 = arith.constant 0 : i32
    %c0_i32_0 = arith.constant 0 : i32
    return %arg0, %c0_i32 : i32, i32
  }
}

</mosaic_0001>

<bundles_post_ra>
// kernel: tpu_custom_call.1
= control target key start
LH: loop header
LB: loop body
LE: loop exit
PB: predicated region body
PF: predicated region fallthrough
CT: control target
= control target key end

     0   :  { %s1796_s18 = smov 0   ;;  %s2410_s0 = inlined_call_operand.vmem [shape: bf16[512,32], index: 0, kind: input, shape index: {}]   ;;  %s2411_s1 = inlined_call_operand.vmem [shape: bf16[32,8], index: 1, kind: input, shape index: {}]   ;;  %s2412_s2 = inlined_call_operand.vmem [shape: f32[1,8], index: 2, kind: input, shape index: {}]   ;;  %s2413_s3 = inlined_call_operand.vmem [shape: bf16[512,8], index: 3, kind: input, shape index: {}]   ;;  %s2414_s4 = inlined_call_operand.vmem [shape: f32[512,8], index: 4, kind: output, shape index: {0}]   ;;  %s2415_s5 = inlined_call_operand.vmem [shape: f32[512,8], index: 5, kind: output, shape index: {1}]  }
   0x1 LB: > { %s1353_s19 = sadd.s32 4294967295, %s1764_s18   ;;  %p1357_p0 = scmp.ge.s32.totalorder %s1764_s18, 1  ;;  %s1764_s18 = sphi %s1796_s18, %s16_s18  }
   0x2   : > { %p202_p1 = scmp.lt.s32.totalorder %s1764_s18, 3 }
   0x4   : > { %p203_p2 = pnand %p1357_p0, %p202_p1 }
   0x6   : > { %206 = sbr.rel (%p203_p2) target bundleno = 616 (0x268), region = 36 }
   0xb   : > { %v1548_v0 = vld [vmem:[%s2411_s1 + $0x8] sm:$0xff]   ;;  %s1358_s22 = sshll.u32 %s1353_s19, 5  ;;  %v1549_v1 = vld [vmem:[%s2411_s1] sm:$0xff]   ;;  %vm400_vm0 = vcmask 261120   ;;  %vm706_vm1 = vcmask 64512  }
   0xc   : > { %p241_p3 = scmp.lt.s32.totalorder %s1358_s22, 63  ;;  %1500 = vmatprep.subr.bf16.mxu0 %v1548_v0  ;;  %1536 = vmatprep.subr.bf16.mxu1 %v1548_v0  ;;  %v1864_v20 = vld [vmem:[%s2412_s2] ss:$0 sm:$0xff] }
   0xd   : > { %1501 = vmatpush3.bf16.msra.mxu0 %v1548_v0  ;;  %1538 = vmatpush3.bf16.msra.mxu1 %v1548_v0 }
   0xe   : > { %s2462_s22 = smov (!%p241_p3, %s1358_s22), 63  ;;  %1502 = vmatprep.subr.bf16.mxu0 %v1549_v1  ;;  %1537 = vmatprep.subr.bf16.mxu1 %v1549_v1 }
   0xf   : > { %s1359_s25 = sshll.u32 %s2462_s22, 2  ;;  %s1363_s9 = sshll.u32 %s2462_s22, 3 }
  0x10   : > { %s1818_s28 = scalar_lea.vmem %s2410_s0, %s1359_s25  ;;  %s1857_s6 = scalar_lea.vmem %s2413_s3, %s1359_s25 }
  0x11   : > { %1503 = vmatpush3.bf16.msra.mxu0 %v1549_v1  ;;  %1539 = vmatpush3.bf16.msra.mxu1 %v1549_v1  ;;  %v1550_v2 = vld [vmem:[%s1818_s28] sm:$0xff]   ;;  %v1552_v4 = vld [vmem:[%s1818_s28 + $0x8] sm:$0xff]   ;;  %v1554_v6 = vld [vmem:[%s1818_s28 + $0x10] sm:$0xff]   ;;  %s2207_s12 = scalar_lea.vmem %s2414_s4, %s1363_s9  ;;  %s2239_s15 = scalar_lea.vmem %s2415_s5, %s1363_s9 }
  0x12   : > { %v1551_v3 = vld [vmem:[%s1818_s28 + $0x40] sm:$0xff]   ;;  %1504 = vmatprep.mubr.msk.bf16.mxu0 %vm400_vm0, %v1550_v2  ;;  %v1553_v5 = vld [vmem:[%s1818_s28 + $0x48] sm:$0xff]   ;;  %v1556_v7 = vld [vmem:[%s1818_s28 + $0x50] sm:$0xff]  }
  0x13   : > { %1520 = vmatprep.mubr.msk.bf16.mxu1 %vm400_vm0, %v1551_v3  ;;  %v1555_v8 = vld [vmem:[%s1818_s28 + $0x18] sm:$0xff]   ;;  %v1558_v10 = vld [vmem:[%s1818_s28 + $0x20] sm:$0xff]   ;;  %v1559_v12 = vld [vmem:[%s1818_s28 + $0x28] sm:$0xff]  }
  0x14   : > { %1505 = vmatmul.mubr.msk.bf16.vlgmr.msra.gmra.mxu0 %vm400_vm0, %v1552_v4  ;;  %1521 = vmatmul.mubr.msk.bf16.vlgmr.msra.gmra.mxu1 %vm400_vm0, %v1553_v5  ;;  %v1557_v9 = vld [vmem:[%s1818_s28 + $0x58] sm:$0xff]   ;;  %v1560_v11 = vld [vmem:[%s1818_s28 + $0x60] sm:$0xff]   ;;  %v1561_v13 = vld [vmem:[%s1818_s28 + $0x68] sm:$0xff]  }
  0x15   : > { %1508 = vmatprep.mubr.msk.bf16.mxu0 %vm400_vm0, %v1554_v6  ;;  %1524 = vmatprep.mubr.msk.bf16.mxu1 %vm400_vm0, %v1556_v7  ;;  %v1562_v14 = vld [vmem:[%s1818_s28 + $0x30] sm:$0xff]   ;;  %v1563_v16 = vld [vmem:[%s1818_s28 + $0x38] sm:$0xff]   ;;  %v1467_v18 = vld [vmem:[%s1857_s6 + $0x8] sm:$0xff]  }
  0x16   : > { %v1564_v15 = vld [vmem:[%s1818_s28 + $0x70] sm:$0xff]   ;;  %v1565_v17 = vld [vmem:[%s1818_s28 + $0x78] sm:$0xff]   ;;  %v1475_v19 = vld [vmem:[%s1857_s6 + $0x48] sm:$0xff]   ;;  %v1409_v21 = vunpack.c.l.bf16 %v1467_v18  ;;  %v1410_v34 = vunpack.c.h.bf16 %v1467_v18 }
  0x17   : > { %v1404_v22 = vld [vmem:[%s1857_s6] sm:$0xff]   ;;  %v1441_v24 = vunpack.c.l.bf16 %v1475_v19  ;;  %v1442_v40 = vunpack.c.h.bf16 %v1475_v19  ;;  %v1469_v50 = vld [vmem:[%s1857_s6 + $0x18] sm:$0xff]  }
  0x18   : > { %v1405_v29 = vunpack.c.l.bf16 %v1404_v22  ;;  %v1474_v30 = vld [vmem:[%s1857_s6 + $0x40] sm:$0xff]   ;;  %v1406_v58 = vunpack.c.h.bf16 %v1404_v22  ;;  %v1418_v61 = vunpack.c.h.bf16 %v1469_v50  ;;  %v1417_v0 = vunpack.c.l.bf16 %v1469_v50  ;;  %v1477_v1 = vld [vmem:[%s1857_s6 + $0x58] sm:$0xff]  }
  0x19   : > { %v1437_v37 = vunpack.c.l.bf16 %v1474_v30  ;;  %v1438_v53 = vunpack.c.h.bf16 %v1474_v30  ;;  %v1476_v30 = vld [vmem:[%s1857_s6 + $0x50] sm:$0xff]  }
  0x1c   : > { %1509 = vmatmul.mubr.msk.bf16.gmra.mxu0 %vm400_vm0, %v1555_v8  ;;  %1525 = vmatmul.mubr.msk.bf16.gmra.mxu1 %vm400_vm0, %v1557_v9 }
  0x1d   : > { %1512 = vmatprep.mubr.msk.bf16.mxu0 %vm400_vm0, %v1558_v10  ;;  %1528 = vmatprep.mubr.msk.bf16.mxu1 %vm400_vm0, %v1560_v11  ;;  %v1450_v11 = vunpack.c.h.bf16 %v1477_v1 }
  0x24   : > { %1513 = vmatmul.mubr.msk.bf16.gmra.mxu0 %vm400_vm0, %v1559_v12  ;;  %1529 = vmatmul.mubr.msk.bf16.gmra.mxu1 %vm400_vm0, %v1561_v13 }
  0x25   : > { %1516 = vmatprep.mubr.msk.bf16.mxu0 %vm400_vm0, %v1562_v14  ;;  %1532 = vmatprep.mubr.msk.bf16.mxu1 %vm400_vm0, %v1564_v15  ;;  %v1449_v14 = vunpack.c.l.bf16 %v1477_v1 }
  0x2c   : > { %1517 = vmatmul.mubr.msk.bf16.gmra.mxu0 %vm400_vm0, %v1563_v16  ;;  %1533 = vmatmul.mubr.msk.bf16.gmra.mxu1 %vm400_vm0, %v1565_v17  ;;  %v1468_v17 = vld [vmem:[%s1857_s6 + $0x10] sm:$0xff]  }
  0xd4   : > { %v1506_v23 = vpop.f32.mrf.mxu0  ;;  %v1522_v26 = vpop.f32.mrf.mxu1 }
  0xd5   : > { %v492_v25 = vadd.f32 %v1506_v23, %v1864_v20  ;;  %v556_v27 = vadd.f32 %v1522_v26, %v1864_v20 }
  0xd6   : > { %v483_v28 = vpop.f32.mrf.mxu0  ;;  %v547_v33 = vpop.f32.mrf.mxu1 }
  0xd7   : > { %v1870_v31 = vadd.f32 %v1409_v21, %v492_v25  ;;  %v484_v32 = vadd.f32 %v1864_v20, %v483_v28  ;;  %v1873_v35 = vadd.f32 %v1441_v24, %v556_v27  ;;  %v548_v43 = vadd.f32 %v1864_v20, %v547_v33 }
  0xd8   : > { %v1507_v36 = vpop.f32.mrf.mxu0  ;;  %v1523_v39 = vpop.f32.mrf.mxu1  ;;  %v1414_v27 = vunpack.c.h.bf16 %v1468_v17 }
  0xd9   : > { %v495_v38 = vadd.f32 %v1507_v36, %v1864_v20  ;;  %v713_v41 = vsel %vm706_vm1, %v1870_v31, -inf  ;;  %v1878_v42 = vadd.f32 %v1405_v29, %v484_v32  ;;  %v559_v44 = vadd.f32 %v1523_v39, %v1864_v20  ;;  %v1471_v36 = vld [vmem:[%s1857_s6 + $0x28] sm:$0xff]  }
  0xda   : > { %v761_v45 = vsel %vm706_vm1, %v1873_v35, -inf  ;;  %714 = vmax.xlane.f32.xlu1 %v713_v41  ;;  %v486_v46 = vpop.f32.mrf.mxu0  ;;  %v550_v48 = vpop.f32.mrf.mxu1  ;;  %v1892_v56 = vadd.f32 %v1437_v37, %v548_v43  ;;  %v1413_v29 = vunpack.c.l.bf16 %v1468_v17 }
  0xdb   : > { %v1884_v47 = vadd.f32 %v1410_v34, %v495_v38  ;;  %762 = vmax.xlane.f32.xlu0 %v761_v45  ;;  %v1887_v51 = vadd.f32 %v1442_v40, %v559_v44  ;;  %v551_v52 = vadd.f32 %v1864_v20, %v550_v48  ;;  %v487_v57 = vadd.f32 %v1864_v20, %v486_v46 }
  0xdc   : > { %v1510_v49 = vpop.f32.mrf.mxu0  ;;  %v1526_v55 = vpop.f32.mrf.mxu1  ;;  %v707_v59 = vsel %vm706_vm1, %v1878_v42, -inf  ;;  %v755_v7 = vsel %vm706_vm1, %v1892_v56, -inf  ;;  %v1446_v40 = vunpack.c.h.bf16 %v1476_v30  ;;  %v1445_v44 = vunpack.c.l.bf16 %v1476_v30 }
  0xdd   : > { %v716_v54 = vsel %vm706_vm1, %v1884_v47, -inf  ;;  %v508_v63 = vadd.f32 %v1510_v49, %v1864_v20  ;;  %v1899_v3 = vadd.f32 %v1438_v53, %v551_v52  ;;  %v764_v4 = vsel %vm706_vm1, %v1887_v51, -inf  ;;  %v1479_v53 = vld [vmem:[%s1857_s6 + $0x68] sm:$0xff]  }
  0xde   : > { %717 = vmax.xlane.f32.xlu1 %v716_v54  ;;  %v499_v60 = vpop.f32.mrf.mxu0  ;;  %v563_v62 = vpop.f32.mrf.mxu1  ;;  %v1904_v6 = vadd.f32 %v1406_v58, %v487_v57  ;;  %v572_v13 = vadd.f32 %v1526_v55, %v1864_v20  ;;  %v1426_v49 = vunpack.c.h.bf16 %v1471_v36  ;;  %v1425_v52 = vunpack.c.l.bf16 %v1471_v36 }
  0xdf   : > { %708 = vmax.xlane.f32.xlu0 %v707_v59  ;;  %v1911_v12 = vadd.f32 %v1417_v0, %v508_v63  ;;  %v758_v16 = vsel %vm706_vm1, %v1899_v3, -inf  ;;  %v500_v28 = vadd.f32 %v1864_v20, %v499_v60  ;;  %v564_v43 = vadd.f32 %v1864_v20, %v563_v62 }
  0xe0   : > { %v1511_v2 = vpop.f32.mrf.mxu0  ;;  %v1527_v8 = vpop.f32.mrf.mxu1  ;;  %v710_v18 = vsel %vm706_vm1, %v1904_v6, -inf  ;;  %v1923_v23 = vadd.f32 %v1449_v14, %v572_v13  ;;  %v1458_v62 = vunpack.c.h.bf16 %v1479_v53  ;;  %v1457_v1 = vunpack.c.l.bf16 %v1479_v53 }
  0xe1   : > { %v511_v5 = vadd.f32 %v1511_v2, %v1864_v20  ;;  %v575_v10 = vadd.f32 %v1527_v8, %v1864_v20  ;;  %v725_v25 = vsel %vm706_vm1, %v1911_v12, -inf  ;;  %v1938_v41 = vadd.f32 %v1413_v29, %v500_v28 }
  0xe2   : > { %765 = vmax.xlane.f32.xlu1 %v764_v4  ;;  %v502_v15 = vpop.f32.mrf.mxu0  ;;  %v566_v24 = vpop.f32.mrf.mxu1  ;;  %v773_v37 = vsel %vm706_vm1, %v1923_v23, -inf  ;;  %v1948_v57 = vadd.f32 %v1445_v44, %v564_v43 }
  0xe3   : > { %v1908_v9 = vadd.f32 %v1418_v61, %v511_v5  ;;  %756 = vmax.xlane.f32.xlu0 %v755_v7  ;;  %v1919_v21 = vadd.f32 %v1450_v11, %v575_v10  ;;  %v503_v26 = vadd.f32 %v1864_v20, %v502_v15  ;;  %v567_v39 = vadd.f32 %v1864_v20, %v566_v24  ;;  %v1470_v5 = vld [vmem:[%s1857_s6 + $0x20] sm:$0xff]  }
  0xe4   : > { %v1514_v19 = vpop.f32.mrf.mxu0  ;;  %v1530_v33 = vpop.f32.mrf.mxu1  ;;  %v719_v58 = vsel %vm706_vm1, %v1938_v41, -inf  ;;  %v767_v7 = vsel %vm706_vm1, %v1948_v57, -inf  ;;  %v1422_v17 = vunpack.c.h.bf16 %v1470_v5 }
  0xe5   : > { %v728_v22 = vsel %vm706_vm1, %v1908_v9, -inf  ;;  %v776_v34 = vsel %vm706_vm1, %v1919_v21, -inf  ;;  %v1935_v38 = vadd.f32 %v1414_v27, %v503_v26  ;;  %v524_v50 = vadd.f32 %v1514_v19, %v1864_v20  ;;  %v1473_v27 = vld [vmem:[%s1857_s6 + $0x38] sm:$0xff]  }
  0xe6   : > { %759 = vmax.xlane.f32.xlu1 %v758_v16  ;;  %v515_v32 = vpop.f32.mrf.mxu0  ;;  %v579_v46 = vpop.f32.mrf.mxu1  ;;  %v1944_v54 = vadd.f32 %v1446_v40, %v567_v39  ;;  %v588_v0 = vadd.f32 %v1530_v33, %v1864_v20  ;;  %v1421_v19 = vunpack.c.l.bf16 %v1470_v5  ;;  %v1434_v43 = vunpack.c.h.bf16 %v1473_v27 }
  0xe7   : > { %711 = vmax.xlane.f32.xlu0 %v710_v18  ;;  %v722_v55 = vsel %vm706_vm1, %v1935_v38, -inf  ;;  %v1955_v63 = vadd.f32 %v1425_v52, %v524_v50  ;;  %v516_v18 = vadd.f32 %v1864_v20, %v515_v32 }
  0xe8   : > { %v1515_v45 = vpop.f32.mrf.mxu0  ;;  %v1531_v59 = vpop.f32.mrf.mxu1  ;;  %v770_v4 = vsel %vm706_vm1, %v1944_v54, -inf  ;;  %v1967_v13 = vadd.f32 %v1457_v1, %v588_v0 }
  0xe9   : > { %v527_v48 = vadd.f32 %v1515_v45, %v1864_v20  ;;  %v591_v61 = vadd.f32 %v1531_v59, %v1864_v20  ;;  %2432 = vst [vmem:[#allocation3_spill] sm:$0xff] %v1955_v63  ;;  %v737_v15 = vsel %vm706_vm1, %v1955_v63, -inf  ;;  %v1982_v32 = vadd.f32 %v1421_v19, %v516_v18  ;;  %v1481_v18 = vld [vmem:[%s1857_s6 + $0x78] sm:$0xff]  }
  0xea   : > { %729 = vmax.xlane.f32.xlu1 %v728_v22  ;;  %v518_v2 = vpop.f32.mrf.mxu0  ;;  %v582_v14 = vpop.f32.mrf.mxu1  ;;  %v1478_v22 = vld [vmem:[%s1857_s6 + $0x60] sm:$0xff]   ;;  %v785_v28 = vsel %vm706_vm1, %v1967_v13, -inf  ;;  %v1433_v45 = vunpack.c.l.bf16 %v1473_v27 }
  0xeb   : > { %726 = vmax.xlane.f32.xlu0 %v725_v25  ;;  %v1952_v60 = vadd.f32 %v1426_v49, %v527_v48  ;;  %v1963_v10 = vadd.f32 %v1458_v62, %v591_v61  ;;  %v519_v16 = vadd.f32 %v1864_v20, %v518_v2  ;;  %v583_v30 = vadd.f32 %v1864_v20, %v582_v14 }
  0xec   : > { %v1518_v8 = vpop.f32.mrf.mxu0  ;;  %v1534_v25 = vpop.f32.mrf.mxu1  ;;  %v1454_v33 = vunpack.c.h.bf16 %v1478_v22  ;;  %v1453_v36 = vunpack.c.l.bf16 %v1478_v22  ;;  %v731_v52 = vsel %vm706_vm1, %v1982_v32, -inf }
  0xed   : > { %2431 = vst [vmem:[#allocation2_spill] sm:$0xff] %v1952_v60  ;;  %2433 = vst [vmem:[#allocation4_spill] sm:$0xff] %v1963_v10  ;;  %v740_v11 = vsel %vm706_vm1, %v1952_v60, -inf  ;;  %v788_v26 = vsel %vm706_vm1, %v1963_v10, -inf  ;;  %v1979_v29 = vadd.f32 %v1422_v17, %v519_v16  ;;  %v540_v44 = vadd.f32 %v1518_v8, %v1864_v20 }
  0xee   : > { %777 = vmax.xlane.f32.xlu1 %v776_v34  ;;  %v531_v24 = vpop.f32.mrf.mxu0  ;;  %v580_v34 = vadd.f32 %v1864_v20, %v579_v46  ;;  %v595_v39 = vpop.f32.mrf.mxu1  ;;  %v1987_v48 = vadd.f32 %v1454_v33, %v583_v30  ;;  %v1472_v46 = vld [vmem:[%s1857_s6 + $0x30] sm:$0xff]   ;;  %v604_v30 = vadd.f32 %v1534_v25, %v1864_v20  ;;  %v1465_v33 = vunpack.c.l.bf16 %v1481_v18 }
  0xef   : > { %774 = vmax.xlane.f32.xlu0 %v773_v37  ;;  %2434 = vst [vmem:[#allocation5_spill] sm:$0xff] %v1979_v29  ;;  %v734_v49 = vsel %vm706_vm1, %v1979_v29, -inf  ;;  %v1998_v59 = vadd.f32 %v1433_v45, %v540_v44  ;;  %v1430_v62 = vunpack.c.h.bf16 %v1472_v46  ;;  %v532_v1 = vadd.f32 %v1864_v20, %v531_v24 }
  0xf0   : > { %v1519_v37 = vpop.f32.mrf.mxu0  ;;  %2435 = vst [vmem:[#allocation6_spill] sm:$0xff] %v1987_v48  ;;  %v1991_v50 = vadd.f32 %v1453_v36, %v580_v34  ;;  %v782_v0 = vsel %vm706_vm1, %v1987_v48, -inf  ;;  %v1429_v2 = vunpack.c.l.bf16 %v1472_v46  ;;  %v596_v19 = vadd.f32 %v1864_v20, %v595_v39 }
  0xf1   : > { %v543_v40 = vadd.f32 %v1519_v37, %v1864_v20  ;;  %2438 = vst [vmem:[#allocation9_spill] sm:$0xff] %v1998_v59 }
  0xf2   : > { %723 = vmax.xlane.f32.xlu1 %v722_v55  ;;  %2436 = vst [vmem:[#allocation7_spill] sm:$0xff] %v1991_v50  ;;  %v534_v53 = vpop.f32.mrf.mxu0  ;;  %v1535_v55 = vpop.f32.mrf.mxu1  ;;  %v779_v5 = vsel %vm706_vm1, %v1991_v50, -inf  ;;  %v2014_v17 = vadd.f32 %v1429_v2, %v532_v1 }
  0xf3   : > { %720 = vmax.xlane.f32.xlu0 %v719_v58  ;;  %v1996_v58 = vadd.f32 %v1434_v43, %v543_v40  ;;  %v535_v61 = vadd.f32 %v1864_v20, %v534_v53  ;;  %v607_v24 = vadd.f32 %v1535_v55, %v1864_v20  ;;  %v2032_v40 = vadd.f32 %v1465_v33, %v604_v30 }
  0xf4   : > { %2440 = vst [vmem:[#allocation11_spill] sm:$0xff] %v2014_v17  ;;  %v743_v36 = vsel %vm706_vm1, %v2014_v17, -inf }
  0xf5   : > { %2437 = vst [vmem:[#allocation8_spill] sm:$0xff] %v1996_v58  ;;  %v752_v8 = vsel %vm706_vm1, %v1996_v58, -inf  ;;  %v2011_v14 = vadd.f32 %v1430_v62, %v535_v61  ;;  %2443 = vst [vmem:[#allocation14_spill] sm:$0xff] %v2032_v40  ;;  %v797_v25 = vsel %vm706_vm1, %v2032_v40, -inf }
  0xf6   : > { %771 = vmax.xlane.f32.xlu1 %v770_v4  ;;  %v1480_v4 = vld [vmem:[%s1857_s6 + $0x70] sm:$0xff]  }
  0xf7   : > { %768 = vmax.xlane.f32.xlu0 %v767_v7  ;;  %v598_v7 = vpop.f32.mrf.mxu1  ;;  %2439 = vst [vmem:[#allocation10_spill] sm:$0xff] %v2011_v14  ;;  %v1462_v16 = vunpack.c.h.bf16 %v1480_v4  ;;  %v1461_v22 = vunpack.c.l.bf16 %v1480_v4 }
  0xf9   : > { %v2024_v34 = vadd.f32 %v1461_v22, %v596_v19 }
  0xfa   : > { %741 = vmax.xlane.f32.xlu1 %v740_v11  ;;  %v749_v11 = vsel %vm706_vm1, %v1998_v59, -inf }
  0xfb   : > { %738 = vmax.xlane.f32.xlu0 %v737_v15  ;;  %v599_v15 = vadd.f32 %v1864_v20, %v598_v7  ;;  %v791_v43 = vsel %vm706_vm1, %v2024_v34, -inf }
  0xfd   : > { %v2019_v27 = vadd.f32 %v1462_v16, %v599_v15 }
  0xfe   : > { %789 = vmax.xlane.f32.xlu1 %v788_v26  ;;  %v1466_v26 = vunpack.c.h.bf16 %v1481_v18 }
  0xff   : > { %786 = vmax.xlane.f32.xlu0 %v785_v28  ;;  %2441 = vst [vmem:[#allocation12_spill] sm:$0xff] %v2019_v27  ;;  %v746_v28 = vsel %vm706_vm1, %v2011_v14, -inf  ;;  %v794_v39 = vsel %vm706_vm1, %v2019_v27, -inf }
 0x100   : > { %v2028_v37 = vadd.f32 %v1466_v26, %v607_v24 }
 0x102   : > { %735 = vmax.xlane.f32.xlu1 %v734_v49  ;;  %2442 = vst [vmem:[#allocation13_spill] sm:$0xff] %v2028_v37  ;;  %v800_v20 = vsel %vm706_vm1, %v2028_v37, -inf }
 0x103   : > { %732 = vmax.xlane.f32.xlu0 %v731_v52 }
 0x106   : > { %783 = vmax.xlane.f32.xlu1 %v782_v0 }
 0x107   : > { %780 = vmax.xlane.f32.xlu0 %v779_v5 }
 0x10a   : > { %753 = vmax.xlane.f32.xlu1 %v752_v8 }
 0x10b   : > { %750 = vmax.xlane.f32.xlu0 %v749_v11 }
 0x10e   : > { %747 = vmax.xlane.f32.xlu1 %v746_v28 }
 0x10f   : > { %744 = vmax.xlane.f32.xlu0 %v743_v36 }
 0x112   : > { %795 = vmax.xlane.f32.xlu1 %v794_v39 }
 0x113   : > { %792 = vmax.xlane.f32.xlu0 %v791_v43 }
 0x116   : > { %801 = vmax.xlane.f32.xlu1 %v800_v20 }
 0x117   : > { %798 = vmax.xlane.f32.xlu0 %v797_v25 }
 0x163   : > { %v2040_v44 = vpop.xlane.xlu1 %714 }
 0x164   : > { %v2042_v45 = vpop.xlane.xlu0 %762  ;;  %v805_v49 = vsub.f32 %v1870_v31, %v2040_v44 }
 0x165   : > { %v821_v46 = vsub.f32 %v1873_v35, %v2042_v45 }
 0x166   : > { %v839_v52 = vmul.f32 1.442695, %v805_v49 }
 0x167   : > { %v871_v53 = vmul.f32 1.442695, %v821_v46  ;;  %v2048_v55 = vpop.xlane.xlu1 %717 }
 0x168   : > { %1566 = vpow2.f32 %v839_v52  ;;  %v806_v61 = vsub.f32 %v1884_v47, %v2048_v55  ;;  %v2052_v62 = vpop.xlane.xlu0 %708 }
 0x169   : > { %v803_v0 = vsub.f32 %v1878_v42, %v2052_v62  ;;  %1568 = vpow2.f32 %v871_v53 }
 0x16a   : > { %v841_v1 = vmul.f32 1.442695, %v806_v61 }
 0x16b   : > { %v835_v2 = vmul.f32 1.442695, %v803_v0  ;;  %v2056_v4 = vpop.xlane.xlu1 %765 }
 0x16c   : > { %1570 = vpow2.f32 %v841_v1  ;;  %v822_v5 = vsub.f32 %v1887_v51, %v2056_v4  ;;  %v2060_v7 = vpop.xlane.xlu0 %756 }
 0x16d   : > { %v819_v8 = vsub.f32 %v1892_v56, %v2060_v7  ;;  %1572 = vpow2.f32 %v835_v2 }
 0x16e   : > { %v873_v11 = vmul.f32 1.442695, %v822_v5 }
 0x16f   : > { %v867_v15 = vmul.f32 1.442695, %v819_v8  ;;  %v2064_v16 = vpop.xlane.xlu1 %759 }
 0x170   : > { %1574 = vpow2.f32 %v873_v11  ;;  %v820_v18 = vsub.f32 %v1899_v3, %v2064_v16  ;;  %v2068_v19 = vpop.xlane.xlu0 %711 }
 0x171   : > { %v804_v22 = vsub.f32 %v1904_v6, %v2068_v19  ;;  %1576 = vpow2.f32 %v867_v15 }
 0x172   : > { %v869_v24 = vmul.f32 1.442695, %v820_v18 }
 0x173   : > { %v837_v26 = vmul.f32 1.442695, %v804_v22  ;;  %v2072_v28 = vpop.xlane.xlu1 %729 }
 0x174   : > { %v810_v30 = vsub.f32 %v1908_v9, %v2072_v28  ;;  %v2076_v33 = vpop.xlane.xlu0 %726 }
 0x175   : > { %v1567_v36 = vpop.eup %1566  ;;  %1578 = vpow2.f32 %v837_v26  ;;  %v809_v39 = vsub.f32 %v1911_v12, %v2076_v33 }
 0x176   : > { %v905_v43 = vsel %vm706_vm1, %v1567_v36, 0.0  ;;  %v1569_v20 = vpop.eup %1568  ;;  %1580 = vpow2.f32 %v869_v24  ;;  %v849_v25 = vmul.f32 1.442695, %v810_v30 }
 0x177   : > { %v847_v49 = vmul.f32 1.442695, %v809_v39  ;;  %v2081_v46 = vpop.xlane.xlu1 %777  ;;  %906 = vadd.xlane.f32.xlu0 %v905_v43  ;;  %v953_v2 = vsel %vm706_vm1, %v1569_v20, 0.0 }
 0x178   : > { %v826_v52 = vsub.f32 %v1919_v21, %v2081_v46  ;;  %v2085_v53 = vpop.xlane.xlu0 %774 }
 0x179   : > { %v1571_v61 = vpop.eup %1570  ;;  %1582 = vpow2.f32 %v847_v49  ;;  %v825_v0 = vsub.f32 %v1923_v23, %v2085_v53 }
 0x17a   : > { %v908_v1 = vsel %vm706_vm1, %v1571_v61, 0.0  ;;  %v1573_v5 = vpop.eup %1572  ;;  %1584 = vpow2.f32 %v849_v25  ;;  %v881_v8 = vmul.f32 1.442695, %v826_v52 }
 0x17b   : > { %v879_v11 = vmul.f32 1.442695, %v825_v0  ;;  %909 = vadd.xlane.f32.xlu1 %v908_v1  ;;  %v2091_v15 = vpop.xlane.xlu1 %723  ;;  %954 = vadd.xlane.f32.xlu0 %v953_v2  ;;  %v899_v36 = vsel %vm706_vm1, %v1573_v5, 0.0 }
 0x17c   : > { %v808_v18 = vsub.f32 %v1935_v38, %v2091_v15  ;;  %v2095_v22 = vpop.xlane.xlu0 %720 }
 0x17d   : > { %v1575_v24 = vpop.eup %1574  ;;  %1586 = vpow2.f32 %v879_v11  ;;  %v807_v26 = vsub.f32 %v1938_v41, %v2095_v22 }
 0x17e   : > { %v956_v30 = vsel %vm706_vm1, %v1575_v24, 0.0  ;;  %v1577_v39 = vpop.eup %1576  ;;  %1588 = vpow2.f32 %v881_v8  ;;  %v845_v43 = vmul.f32 1.442695, %v808_v18 }
 0x17f   : > { %v843_v20 = vmul.f32 1.442695, %v807_v26  ;;  %957 = vadd.xlane.f32.xlu1 %v956_v30  ;;  %v2101_v25 = vpop.xlane.xlu1 %771  ;;  %900 = vadd.xlane.f32.xlu0 %v899_v36  ;;  %v947_v2 = vsel %vm706_vm1, %v1577_v39, 0.0 }
 0x180   : > { %v824_v49 = vsub.f32 %v1944_v54, %v2101_v25  ;;  %v2105_v52 = vpop.xlane.xlu0 %768 }
 0x181   : > { %1590 = vpow2.f32 %v843_v20  ;;  %v823_v61 = vsub.f32 %v1948_v57, %v2105_v52 }
 0x182   : > { %v1579_v0 = vpop.eup %1578  ;;  %v877_v1 = vmul.f32 1.442695, %v824_v49  ;;  %1592 = vpow2.f32 %v845_v43 }
 0x183   : > { %v875_v5 = vmul.f32 1.442695, %v823_v61  ;;  %v2110_v8 = vpop.xlane.xlu1 %741  ;;  %948 = vadd.xlane.f32.xlu0 %v947_v2  ;;  %v902_v11 = vsel %vm706_vm1, %v1579_v0, 0.0  ;;  %v1581_v18 = vpop.eup %1580 }
 0x184   : > { %v814_v24 = vsub.f32 %v1952_v60, %v2110_v8  ;;  %903 = vadd.xlane.f32.xlu1 %v902_v11  ;;  %v2115_v26 = vpop.xlane.xlu0 %738  ;;  %v950_v49 = vsel %vm706_vm1, %v1581_v18, 0.0 }
 0x185   : > { %1594 = vpow2.f32 %v875_v5  ;;  %v813_v30 = vsub.f32 %v1955_v63, %v2115_v26 }
 0x186   : > { %v1583_v36 = vpop.eup %1582  ;;  %1596 = vpow2.f32 %v877_v1  ;;  %v857_v39 = vmul.f32 1.442695, %v814_v24 }
 0x187   : > { %v855_v43 = vmul.f32 1.442695, %v813_v30  ;;  %v2119_v20 = vpop.xlane.xlu1 %789  ;;  %v917_v61 = vsel %vm706_vm1, %v1583_v36, 0.0  ;;  %v1585_v0 = vpop.eup %1584 }
 0x188   : > { %2444 = vst [vmem:[#allocation15_spill] sm:$0xff] %v2119_v20  ;;  %v830_v2 = vsub.f32 %v1963_v10, %v2119_v20  ;;  %951 = vadd.xlane.f32.xlu1 %v950_v49  ;;  %918 = vadd.xlane.f32.xlu0 %v917_v61  ;;  %v2125_v5 = vpop.xlane.xlu0 %786  ;;  %v920_v18 = vsel %vm706_vm1, %v1585_v0, 0.0 }
 0x189   : > { %1598 = vpow2.f32 %v855_v43  ;;  %v829_v1 = vsub.f32 %v1967_v13, %v2125_v5 }
 0x18a   : > { %v1587_v11 = vpop.eup %1586  ;;  %1600 = vpow2.f32 %v857_v39  ;;  %v889_v24 = vmul.f32 1.442695, %v830_v2 }
 0x18b   : > { %v887_v30 = vmul.f32 1.442695, %v829_v1  ;;  %v2129_v60 = vpop.xlane.xlu1 %735  ;;  %v965_v36 = vsel %vm706_vm1, %v1587_v11, 0.0  ;;  %v1589_v63 = vpop.eup %1588 }
 0x18c   : > { %2445 = vst [vmem:[#allocation16_spill] sm:$0xff] %v2129_v60  ;;  %v812_v49 = vsub.f32 %v1979_v29, %v2129_v60  ;;  %921 = vadd.xlane.f32.xlu1 %v920_v18  ;;  %966 = vadd.xlane.f32.xlu0 %v965_v36  ;;  %v2135_v43 = vpop.xlane.xlu0 %732  ;;  %v968_v0 = vsel %vm706_vm1, %v1589_v63, 0.0 }
 0x18d   : > { %1602 = vpow2.f32 %v887_v30  ;;  %v811_v39 = vsub.f32 %v1982_v32, %v2135_v43 }
 0x18e   : > { %v1591_v61 = vpop.eup %1590  ;;  %1604 = vpow2.f32 %v889_v24  ;;  %v853_v2 = vmul.f32 1.442695, %v812_v49 }
 0x18f   : > { %v851_v1 = vmul.f32 1.442695, %v811_v39  ;;  %v2139_v10 = vpop.xlane.xlu1 %783  ;;  %v911_v11 = vsel %vm706_vm1, %v1591_v61, 0.0  ;;  %v1593_v20 = vpop.eup %1592 }
 0x190   : > { %v828_v18 = vsub.f32 %v1987_v48, %v2139_v10  ;;  %969 = vadd.xlane.f32.xlu1 %v968_v0  ;;  %912 = vadd.xlane.f32.xlu0 %v911_v11  ;;  %v2145_v30 = vpop.xlane.xlu0 %780  ;;  %v914_v61 = vsel %vm706_vm1, %v1593_v20, 0.0 }
 0x191   : > { %1606 = vpow2.f32 %v851_v1  ;;  %v827_v24 = vsub.f32 %v1991_v50, %v2145_v30 }
 0x192   : > { %v1595_v36 = vpop.eup %1594  ;;  %1608 = vpow2.f32 %v853_v2  ;;  %v885_v39 = vmul.f32 1.442695, %v828_v18 }
 0x193   : > { %v1597_v49 = vpop.eup %1596  ;;  %v883_v29 = vmul.f32 1.442695, %v827_v24  ;;  %v2149_v63 = vpop.xlane.xlu1 %753  ;;  %v959_v60 = vsel %vm706_vm1, %v1595_v36, 0.0 }
 0x194   : > { %v818_v0 = vsub.f32 %v1996_v58, %v2149_v63  ;;  %915 = vadd.xlane.f32.xlu1 %v914_v61  ;;  %960 = vadd.xlane.f32.xlu0 %v959_v60  ;;  %v2155_v1 = vpop.xlane.xlu0 %750  ;;  %v962_v18 = vsel %vm706_vm1, %v1597_v49, 0.0 }
 0x195   : > { %1610 = vpow2.f32 %v883_v29  ;;  %v817_v2 = vsub.f32 %v1998_v59, %v2155_v1 }
 0x196   : > { %v1599_v11 = vpop.eup %1598  ;;  %1612 = vpow2.f32 %v885_v39  ;;  %v865_v48 = vmul.f32 1.442695, %v818_v0 }
 0x197   : > { %v1601_v24 = vpop.eup %1600  ;;  %v863_v20 = vmul.f32 1.442695, %v817_v2  ;;  %v2160_v50 = vpop.xlane.xlu1 %747  ;;  %v929_v36 = vsel %vm706_vm1, %v1599_v11, 0.0 }
 0x198   : > { %v816_v60 = vsub.f32 %v2011_v14, %v2160_v50  ;;  %963 = vadd.xlane.f32.xlu1 %v962_v18  ;;  %930 = vadd.xlane.f32.xlu0 %v929_v36  ;;  %v2165_v29 = vpop.xlane.xlu0 %744  ;;  %v932_v39 = vsel %vm706_vm1, %v1601_v24, 0.0 }
 0x199   : > { %1614 = vpow2.f32 %v863_v20  ;;  %v815_v61 = vsub.f32 %v2014_v17, %v2165_v29 }
 0x19a   : > { %v1603_v49 = vpop.eup %1602  ;;  %1616 = vpow2.f32 %v865_v48  ;;  %v861_v2 = vmul.f32 1.442695, %v816_v60 }
 0x19b   : > { %v1605_v0 = vpop.eup %1604  ;;  %v859_v58 = vmul.f32 1.442695, %v815_v61  ;;  %v2170_v59 = vpop.xlane.xlu1 %795  ;;  %v977_v11 = vsel %vm706_vm1, %v1603_v49, 0.0 }
 0x19c   : > { %v832_v18 = vsub.f32 %v2019_v27, %v2170_v59  ;;  %933 = vadd.xlane.f32.xlu1 %v932_v39  ;;  %978 = vadd.xlane.f32.xlu0 %v977_v11  ;;  %v2175_v20 = vpop.xlane.xlu0 %792  ;;  %v980_v48 = vsel %vm706_vm1, %v1605_v0, 0.0 }
 0x19d   : > { %1618 = vpow2.f32 %v859_v58  ;;  %v831_v36 = vsub.f32 %v2024_v34, %v2175_v20 }
 0x19e   : > { %v1607_v24 = vpop.eup %1606  ;;  %1620 = vpow2.f32 %v861_v2  ;;  %v893_v61 = vmul.f32 1.442695, %v832_v18 }
 0x19f   : > { %v1609_v60 = vpop.eup %1608  ;;  %v891_v14 = vmul.f32 1.442695, %v831_v36  ;;  %v2180_v17 = vpop.xlane.xlu1 %801  ;;  %v923_v49 = vsel %vm706_vm1, %v1607_v24, 0.0 }
 0x1a0   : > { %v834_v39 = vsub.f32 %v2028_v37, %v2180_v17  ;;  %981 = vadd.xlane.f32.xlu1 %v980_v48  ;;  %924 = vadd.xlane.f32.xlu0 %v923_v49  ;;  %v2185_v58 = vpop.xlane.xlu0 %798  ;;  %v926_v2 = vsel %vm706_vm1, %v1609_v60, 0.0 }
 0x1a1   : > { %1622 = vpow2.f32 %v891_v14  ;;  %v833_v11 = vsub.f32 %v2032_v40, %v2185_v58 }
 0x1a2   : > { %v1611_v0 = vpop.eup %1610  ;;  %1624 = vpow2.f32 %v893_v61  ;;  %v897_v18 = vmul.f32 1.442695, %v834_v39 }
 0x1a3   : > { %v895_v36 = vmul.f32 1.442695, %v833_v11  ;;  %v971_v27 = vsel %vm706_vm1, %v1611_v0, 0.0  ;;  %v1613_v24 = vpop.eup %1612 }
 0x1a4   : > { %927 = vadd.xlane.f32.xlu1 %v926_v2  ;;  %972 = vadd.xlane.f32.xlu0 %v971_v27  ;;  %v974_v49 = vsel %vm706_vm1, %v1613_v24, 0.0 }
 0x1a5   : > { %1626 = vpow2.f32 %v895_v36 }
 0x1a6   : > { %v1615_v48 = vpop.eup %1614  ;;  %1628 = vpow2.f32 %v897_v18 }
 0x1a7   : > { %v941_v14 = vsel %vm706_vm1, %v1615_v48, 0.0  ;;  %v1617_v37 = vpop.eup %1616 }
 0x1a8   : > { %975 = vadd.xlane.f32.xlu1 %v974_v49  ;;  %942 = vadd.xlane.f32.xlu0 %v941_v14  ;;  %v944_v60 = vsel %vm706_vm1, %v1617_v37, 0.0 }
 0x1aa   : > { %v1619_v40 = vpop.eup %1618 }
 0x1ab   : > { %v935_v61 = vsel %vm706_vm1, %v1619_v40, 0.0  ;;  %v1621_v39 = vpop.eup %1620 }
 0x1ac   : > { %945 = vadd.xlane.f32.xlu1 %v944_v60  ;;  %936 = vadd.xlane.f32.xlu0 %v935_v61  ;;  %v938_v27 = vsel %vm706_vm1, %v1621_v39, 0.0 }
 0x1ae   : > { %v1623_v11 = vpop.eup %1622 }
 0x1af   : > { %v983_v0 = vsel %vm706_vm1, %v1623_v11, 0.0  ;;  %v1625_v2 = vpop.eup %1624 }
 0x1b0   : > { %939 = vadd.xlane.f32.xlu1 %v938_v27  ;;  %984 = vadd.xlane.f32.xlu0 %v983_v0  ;;  %v986_v36 = vsel %vm706_vm1, %v1625_v2, 0.0 }
 0x1b2   : > { %v1627_v18 = vpop.eup %1626 }
 0x1b3   : > { %v989_v24 = vsel %vm706_vm1, %v1627_v18, 0.0  ;;  %v1629_v48 = vpop.eup %1628 }
 0x1b4   : > { %987 = vadd.xlane.f32.xlu1 %v986_v36  ;;  %990 = vadd.xlane.f32.xlu0 %v989_v24  ;;  %v992_v37 = vsel %vm706_vm1, %v1629_v48, 0.0 }
 0x1b8   : > { %993 = vadd.xlane.f32.xlu1 %v992_v37 }
 0x200   : > { %v907_v40 = vpop.xlane.xlu0 %906 }
 0x201   : > { %1630 = vlog2.f32 %v907_v40 }
 0x204   : > { %v910_v49 = vpop.xlane.xlu1 %909  ;;  %v955_v14 = vpop.xlane.xlu0 %954 }
 0x205   : > { %1632 = vlog2.f32 %v910_v49 }
 0x206   : > { %1634 = vlog2.f32 %v955_v14 }
 0x208   : > { %v958_v60 = vpop.xlane.xlu1 %957  ;;  %v901_v61 = vpop.xlane.xlu0 %900 }
 0x209   : > { %1636 = vlog2.f32 %v958_v60 }
 0x20a   : > { %1638 = vlog2.f32 %v901_v61 }
 0x20c   : > { %v949_v39 = vpop.xlane.xlu0 %948 }
 0x20d   : > { %v904_v11 = vpop.xlane.xlu1 %903  ;;  %1640 = vlog2.f32 %v949_v39 }
 0x20e   : > { %v1631_v27 = vpop.eup %1630  ;;  %1642 = vlog2.f32 %v904_v11 }
 0x20f   : > { %v1000_v0 = vmul.f32 0.6931472, %v1631_v27 }
 0x211   : > { %v1061_v2 = vadd.f32 %v1000_v0, %v2040_v44  ;;  %v952_v18 = vpop.xlane.xlu1 %951  ;;  %v919_v36 = vpop.xlane.xlu0 %918 }
 0x212   : > { %v1633_v24 = vpop.eup %1632  ;;  %1644 = vlog2.f32 %v952_v18 }
 0x213   : > { %v1635_v48 = vpop.eup %1634  ;;  %v1093_v37 = vsub.f32 %v1870_v31, %v1061_v2  ;;  %v1002_v40 = vmul.f32 0.6931472, %v1633_v24  ;;  %1646 = vlog2.f32 %v919_v36 }
 0x214   : > { %v1032_v49 = vmul.f32 0.6931472, %v1635_v48 }
 0x215   : > { %1125 = vst.msk [vmem:[%s2207_s12 + $0x10] sm:$0xff] %vm706_vm1, %v1093_v37  ;;  %v1159_v44 = vmul.f32 1.442695, %v1093_v37  ;;  %v1062_v14 = vadd.f32 %v1002_v40, %v2048_v55  ;;  %v922_v60 = vpop.xlane.xlu1 %921  ;;  %v967_v61 = vpop.xlane.xlu0 %966 }
 0x216   : > { %v1637_v39 = vpop.eup %1636  ;;  %v1077_v11 = vadd.f32 %v1032_v49, %v2042_v45  ;;  %1648 = vlog2.f32 %v922_v60 }
 0x217   : > { %v1639_v27 = vpop.eup %1638  ;;  %1650 = vpow2.f32 %v1159_v44  ;;  %v1094_v31 = vsub.f32 %v1884_v47, %v1062_v14  ;;  %v1034_v0 = vmul.f32 0.6931472, %v1637_v39 }
 0x218   : > { %v1109_v2 = vsub.f32 %v1873_v35, %v1077_v11  ;;  %v996_v18 = vmul.f32 0.6931472, %v1639_v27  ;;  %1652 = vlog2.f32 %v967_v61 }
 0x219   : > { %1126 = vst.msk [vmem:[%s2207_s12 + $0x18] sm:$0xff] %vm706_vm1, %v1094_v31  ;;  %v1161_v36 = vmul.f32 1.442695, %v1094_v31  ;;  %v1078_v55 = vadd.f32 %v1034_v0, %v2056_v4  ;;  %v970_v24 = vpop.xlane.xlu1 %969  ;;  %v913_v48 = vpop.xlane.xlu0 %912 }
 0x21a   : > { %v1641_v37 = vpop.eup %1640  ;;  %1141 = vst.msk [vmem:[%s2207_s12 + $0x90] sm:$0xff] %vm706_vm1, %v1109_v2  ;;  %v1191_v45 = vmul.f32 1.442695, %v1109_v2  ;;  %v1059_v47 = vadd.f32 %v996_v18, %v2052_v62  ;;  %1654 = vlog2.f32 %v970_v24 }
 0x21b   : > { %v1643_v40 = vpop.eup %1642  ;;  %1656 = vpow2.f32 %v1161_v36  ;;  %v1110_v35 = vsub.f32 %v1887_v51, %v1078_v55  ;;  %v1028_v49 = vmul.f32 0.6931472, %v1641_v37 }
 0x21c   : > { %1658 = vpow2.f32 %v1191_v45  ;;  %v1091_v44 = vsub.f32 %v1878_v42, %v1059_v47  ;;  %v998_v14 = vmul.f32 0.6931472, %v1643_v40 }
 0x21d   : > { %1142 = vst.msk [vmem:[%s2207_s12 + $0x98] sm:$0xff] %vm706_vm1, %v1110_v35  ;;  %v1193_v4 = vmul.f32 1.442695, %v1110_v35  ;;  %v1075_v60 = vadd.f32 %v1028_v49, %v2060_v7  ;;  %1660 = vlog2.f32 %v913_v48  ;;  %v916_v61 = vpop.xlane.xlu1 %915  ;;  %v961_v39 = vpop.xlane.xlu0 %960 }
 0x21e   : > { %1123 = vst.msk [vmem:[%s2207_s12] sm:$0xff] %vm706_vm1, %v1091_v44  ;;  %v1155_v62 = vmul.f32 1.442695, %v1091_v44  ;;  %v1060_v51 = vadd.f32 %v998_v14, %v2068_v19  ;;  %1662 = vlog2.f32 %v916_v61 }
 0x21f   : > { %v1645_v11 = vpop.eup %1644  ;;  %1664 = vpow2.f32 %v1193_v4  ;;  %v1107_v42 = vsub.f32 %v1892_v56, %v1075_v60 }
 0x220   : > { %v1647_v27 = vpop.eup %1646  ;;  %1666 = vpow2.f32 %v1155_v62  ;;  %v1092_v31 = vsub.f32 %v1904_v6, %v1060_v51  ;;  %v1030_v7 = vmul.f32 0.6931472, %v1645_v11 }
 0x221   : > { %1139 = vst.msk [vmem:[%s2207_s12 + $0x80] sm:$0xff] %vm706_vm1, %v1107_v42  ;;  %v1187_v0 = vmul.f32 1.442695, %v1107_v42  ;;  %v1008_v2 = vmul.f32 0.6931472, %v1647_v27  ;;  %1668 = vlog2.f32 %v961_v39  ;;  %v964_v18 = vpop.xlane.xlu1 %963  ;;  %v931_v36 = vpop.xlane.xlu0 %930 }
 0x222   : > { %1124 = vst.msk [vmem:[%s2207_s12 + $0x8] sm:$0xff] %vm706_vm1, %v1092_v31  ;;  %v1157_v56 = vmul.f32 1.442695, %v1092_v31  ;;  %v1076_v6 = vadd.f32 %v1030_v7, %v2064_v16  ;;  %1670 = vlog2.f32 %v964_v18 }
 0x223   : > { %v1649_v19 = vpop.eup %1648  ;;  %1672 = vpow2.f32 %v1187_v0  ;;  %v1065_v55 = vadd.f32 %v1008_v2, %v2076_v33 }
 0x224   : > { %v1651_v24 = vpop.eup %1650  ;;  %1674 = vpow2.f32 %v1157_v56  ;;  %v1108_v48 = vsub.f32 %v1899_v3, %v1076_v6  ;;  %v1010_v37 = vmul.f32 0.6931472, %v1649_v19 }
 0x225   : > { %v1653_v45 = vpop.eup %1652  ;;  %1221 = vst.msk [vmem:[%s2239_s15 + $0x10] sm:$0xff] %vm706_vm1, %v1651_v24  ;;  %v1097_v47 = vsub.f32 %v1911_v12, %v1065_v55  ;;  %1676 = vlog2.f32 %v931_v36  ;;  %v934_v40 = vpop.xlane.xlu1 %933 }
 0x226   : > { %v979_v35 = vpop.xlane.xlu0 %978  ;;  %1140 = vst.msk [vmem:[%s2207_s12 + $0x88] sm:$0xff] %vm706_vm1, %v1108_v48  ;;  %v1189_v16 = vmul.f32 1.442695, %v1108_v48  ;;  %v1066_v33 = vadd.f32 %v1010_v37, %v2072_v28  ;;  %v1040_v49 = vmul.f32 0.6931472, %v1653_v45  ;;  %1678 = vlog2.f32 %v934_v40 }
 0x227   : > { %v1655_v44 = vpop.eup %1654  ;;  %1129 = vst.msk [vmem:[%s2207_s12 + $0x30] sm:$0xff] %vm706_vm1, %v1097_v47  ;;  %v1167_v3 = vmul.f32 1.442695, %v1097_v47  ;;  %1680 = vlog2.f32 %v979_v35 }
 0x228   : > { %v1657_v14 = vpop.eup %1656  ;;  %1682 = vpow2.f32 %v1189_v16  ;;  %v1098_v12 = vsub.f32 %v1908_v9, %v1066_v33  ;;  %v1081_v4 = vadd.f32 %v1040_v49, %v2085_v53  ;;  %v1042_v60 = vmul.f32 0.6931472, %v1655_v44 }
 0x229   : > { %v1659_v61 = vpop.eup %1658  ;;  %1222 = vst.msk [vmem:[%s2239_s15 + $0x18] sm:$0xff] %vm706_vm1, %v1657_v14  ;;  %1684 = vpow2.f32 %v1167_v3  ;;  %v982_v28 = vpop.xlane.xlu1 %981 }
 0x22a   : > { %v925_v39 = vpop.xlane.xlu0 %924  ;;  %v1661_v62 = vpop.eup %1660  ;;  %1237 = vst.msk [vmem:[%s2239_s15 + $0x90] sm:$0xff] %vm706_vm1, %v1659_v61  ;;  %1130 = vst.msk [vmem:[%s2207_s12 + $0x38] sm:$0xff] %vm706_vm1, %v1098_v12  ;;  %v1169_v51 = vmul.f32 1.442695, %v1098_v12  ;;  %v1113_v11 = vsub.f32 %v1923_v23, %v1081_v4  ;;  %v1082_v9 = vadd.f32 %v1042_v60, %v2081_v46  ;;  %1686 = vlog2.f32 %v982_v28 }
 0x22b   : > { %v1663_v53 = vpop.eup %1662  ;;  %v1004_v42 = vmul.f32 0.6931472, %v1661_v62  ;;  %1688 = vlog2.f32 %v925_v39 }
 0x22c   : > { %v1665_v27 = vpop.eup %1664  ;;  %1690 = vpow2.f32 %v1169_v51  ;;  %1145 = vst.msk [vmem:[%s2207_s12 + $0xb0] sm:$0xff] %vm706_vm1, %v1113_v11  ;;  %v1199_v31 = vmul.f32 1.442695, %v1113_v11  ;;  %v1114_v7 = vsub.f32 %v1919_v21, %v1082_v9  ;;  %v1006_v0 = vmul.f32 0.6931472, %v1663_v53  ;;  %v2447_v9 = vld [vmem:[#allocation2_spill] sm:$0xff] }
 0x22d   : > { %v1667_v2 = vpop.eup %1666  ;;  %1238 = vst.msk [vmem:[%s2239_s15 + $0x98] sm:$0xff] %vm706_vm1, %v1665_v27  ;;  %v1063_v23 = vadd.f32 %v1004_v42, %v2095_v22  ;;  %v928_v46 = vpop.xlane.xlu1 %927 }
 0x22e   : > { %v973_v18 = vpop.xlane.xlu0 %972  ;;  %v1669_v36 = vpop.eup %1668  ;;  %1219 = vst.msk [vmem:[%s2239_s15] sm:$0xff] %vm706_vm1, %v1667_v2  ;;  %1692 = vpow2.f32 %v1199_v31  ;;  %1146 = vst.msk [vmem:[%s2207_s12 + $0xb8] sm:$0xff] %vm706_vm1, %v1114_v7  ;;  %v1201_v56 = vmul.f32 1.442695, %v1114_v7  ;;  %v1064_v6 = vadd.f32 %v1006_v0, %v2091_v15 }
 0x22f   : > { %v1671_v21 = vpop.eup %1670  ;;  %v1095_v19 = vsub.f32 %v1938_v41, %v1063_v23  ;;  %v1036_v55 = vmul.f32 0.6931472, %v1669_v36  ;;  %1694 = vlog2.f32 %v928_v46  ;;  %v2448_v23 = vld [vmem:[#allocation15_spill] sm:$0xff] }
 0x230   : > { %v1673_v22 = vpop.eup %1672  ;;  %1696 = vpow2.f32 %v1201_v56  ;;  %v1096_v24 = vsub.f32 %v1935_v38, %v1064_v6  ;;  %v1038_v48 = vmul.f32 0.6931472, %v1671_v21  ;;  %v2449_v6 = vld [vmem:[#allocation4_spill] sm:$0xff] }
 0x231   : > { %v1675_v37 = vpop.eup %1674  ;;  %1235 = vst.msk [vmem:[%s2239_s15 + $0x80] sm:$0xff] %vm706_vm1, %v1673_v22  ;;  %1127 = vst.msk [vmem:[%s2207_s12 + $0x20] sm:$0xff] %vm706_vm1, %v1095_v19  ;;  %v1163_v45 = vmul.f32 1.442695, %v1095_v19  ;;  %v1079_v15 = vadd.f32 %v1036_v55, %v2105_v52  ;;  %1698 = vlog2.f32 %v973_v18  ;;  %v976_v47 = vpop.xlane.xlu1 %975 }
 0x232   : > { %v943_v41 = vpop.xlane.xlu0 %942  ;;  %v1677_v40 = vpop.eup %1676  ;;  %1220 = vst.msk [vmem:[%s2239_s15 + $0x8] sm:$0xff] %vm706_vm1, %v1675_v37  ;;  %1128 = vst.msk [vmem:[%s2207_s12 + $0x28] sm:$0xff] %vm706_vm1, %v1096_v24  ;;  %v1165_v35 = vmul.f32 1.442695, %v1096_v24  ;;  %v1080_v38 = vadd.f32 %v1038_v48, %v2101_v25  ;;  %1700 = vlog2.f32 %v976_v47 }
 0x233   : > { %v1679_v16 = vpop.eup %1678  ;;  %1702 = vpow2.f32 %v1163_v45  ;;  %v1111_v33 = vsub.f32 %v1948_v57, %v1079_v15  ;;  %v1016_v52 = vmul.f32 0.6931472, %v1677_v40  ;;  %v2450_v15 = vld [vmem:[#allocation16_spill] sm:$0xff] }
 0x234   : > { %v1681_v49 = vpop.eup %1680  ;;  %1704 = vpow2.f32 %v1165_v35  ;;  %v1112_v44 = vsub.f32 %v1944_v54, %v1080_v38  ;;  %v1018_v3 = vmul.f32 0.6931472, %v1679_v16  ;;  %v2451_v16 = vld [vmem:[#allocation5_spill] sm:$0xff] }
 0x235   : > { %v1683_v14 = vpop.eup %1682  ;;  %1143 = vst.msk [vmem:[%s2207_s12 + $0xa0] sm:$0xff] %vm706_vm1, %v1111_v33  ;;  %v1195_v12 = vmul.f32 1.442695, %v1111_v33  ;;  %v1069_v25 = vadd.f32 %v1016_v52, %v2115_v26  ;;  %v1048_v4 = vmul.f32 0.6931472, %v1681_v49  ;;  %1706 = vlog2.f32 %v943_v41  ;;  %v946_v60 = vpop.xlane.xlu1 %945  ;;  %v2446_v26 = vld [vmem:[#allocation3_spill] sm:$0xff] }
 0x236   : > { %v937_v61 = vpop.xlane.xlu0 %936  ;;  %v1685_v28 = vpop.eup %1684  ;;  %1236 = vst.msk [vmem:[%s2239_s15 + $0x88] sm:$0xff] %vm706_vm1, %v1683_v14  ;;  %1144 = vst.msk [vmem:[%s2207_s12 + $0xa8] sm:$0xff] %vm706_vm1, %v1112_v44  ;;  %v1197_v57 = vmul.f32 1.442695, %v1112_v44  ;;  %v1070_v54 = vadd.f32 %v1018_v3, %v2110_v8  ;;  %1708 = vlog2.f32 %v946_v60 }
 0x237   : > { %v1687_v39 = vpop.eup %1686  ;;  %1225 = vst.msk [vmem:[%s2239_s15 + $0x30] sm:$0xff] %vm706_vm1, %v1685_v28  ;;  %1710 = vpow2.f32 %v1195_v12  ;;  %v1101_v62 = vsub.f32 %v2446_v26, %v1069_v25  ;;  %v1085_v51 = vadd.f32 %v1048_v4, %v2125_v5  ;;  %v2452_v25 = vld [vmem:[#allocation7_spill] sm:$0xff] }
 0x238   : > { %v1689_v11 = vpop.eup %1688  ;;  %1712 = vpow2.f32 %v1197_v57  ;;  %v1102_v53 = vsub.f32 %v2447_v9, %v1070_v54  ;;  %v1050_v42 = vmul.f32 0.6931472, %v1687_v39  ;;  %v2454_v9 = vld [vmem:[#allocation9_spill] sm:$0xff] }
 0x239   : > { %v1691_v27 = vpop.eup %1690  ;;  %1133 = vst.msk [vmem:[%s2207_s12 + $0x50] sm:$0xff] %vm706_vm1, %v1101_v62  ;;  %v1175_v8 = vmul.f32 1.442695, %v1101_v62  ;;  %v1117_v31 = vsub.f32 %v1967_v13, %v1085_v51  ;;  %v1012_v7 = vmul.f32 0.6931472, %v1689_v11  ;;  %1714 = vlog2.f32 %v937_v61  ;;  %v940_v0 = vpop.xlane.xlu1 %939  ;;  %v2453_v61 = vld [vmem:[#allocation6_spill] sm:$0xff] }
 0x23a   : > { %v985_v2 = vpop.xlane.xlu0 %984  ;;  %1226 = vst.msk [vmem:[%s2239_s15 + $0x38] sm:$0xff] %vm706_vm1, %v1691_v27  ;;  %1134 = vst.msk [vmem:[%s2207_s12 + $0x58] sm:$0xff] %vm706_vm1, %v1102_v53  ;;  %v1177_v5 = vmul.f32 1.442695, %v1102_v53  ;;  %v1086_v46 = vadd.f32 %v1050_v42, %v2448_v23  ;;  %1716 = vlog2.f32 %v940_v0 }
 0x23b   : > { %v1693_v18 = vpop.eup %1692  ;;  %1718 = vpow2.f32 %v1175_v8  ;;  %1149 = vst.msk [vmem:[%s2207_s12 + $0xd0] sm:$0xff] %vm706_vm1, %v1117_v31  ;;  %v1207_v13 = vmul.f32 1.442695, %v1117_v31  ;;  %v1067_v36 = vadd.f32 %v1012_v7, %v2135_v43 }
 0x23c   : > { %v1695_v56 = vpop.eup %1694  ;;  %1241 = vst.msk [vmem:[%s2239_s15 + $0xb0] sm:$0xff] %vm706_vm1, %v1693_v18  ;;  %1720 = vpow2.f32 %v1177_v5  ;;  %v1118_v21 = vsub.f32 %v2449_v6, %v1086_v46  ;;  %v2456_v18 = vld [vmem:[#allocation11_spill] sm:$0xff] }
 0x23d   : > { %v1697_v19 = vpop.eup %1696  ;;  %1722 = vpow2.f32 %v1207_v13  ;;  %v1099_v55 = vsub.f32 %v1982_v32, %v1067_v36  ;;  %v1014_v22 = vmul.f32 0.6931472, %v1695_v56  ;;  %v988_v24 = vpop.xlane.xlu1 %987 }
 0x23e   : > { %v1699_v48 = vpop.eup %1698  ;;  %1242 = vst.msk [vmem:[%s2239_s15 + $0xb8] sm:$0xff] %vm706_vm1, %v1697_v19  ;;  %1150 = vst.msk [vmem:[%s2207_s12 + $0xd8] sm:$0xff] %vm706_vm1, %v1118_v21  ;;  %v1209_v43 = vmul.f32 1.442695, %v1118_v21  ;;  %1724 = vlog2.f32 %v985_v2  ;;  %v991_v32 = vpop.xlane.xlu0 %990 }
 0x23f   : > { %v1701_v37 = vpop.eup %1700  ;;  %1131 = vst.msk [vmem:[%s2207_s12 + $0x40] sm:$0xff] %vm706_vm1, %v1099_v55  ;;  %v1171_v45 = vmul.f32 1.442695, %v1099_v55  ;;  %v1068_v47 = vadd.f32 %v1014_v22, %v2450_v15  ;;  %v1044_v41 = vmul.f32 0.6931472, %v1699_v48  ;;  %1726 = vlog2.f32 %v988_v24 }
 0x240   : > { %v1703_v40 = vpop.eup %1702  ;;  %1728 = vpow2.f32 %v1209_v43  ;;  %v1046_v35 = vmul.f32 0.6931472, %v1701_v37 }
 0x241   : > { %v1705_v38 = vpop.eup %1704  ;;  %1223 = vst.msk [vmem:[%s2239_s15 + $0x20] sm:$0xff] %vm706_vm1, %v1703_v40  ;;  %1730 = vpow2.f32 %v1171_v45  ;;  %v1100_v33 = vsub.f32 %v2451_v16, %v1068_v47  ;;  %v1083_v52 = vadd.f32 %v1044_v41, %v2145_v30  ;;  %v994_v49 = vpop.xlane.xlu1 %993  ;;  %v2458_v47 = vld [vmem:[#allocation12_spill] sm:$0xff]  ;;  %v2459_v16 = vld [vmem:[#allocation14_spill] sm:$0xff] }
 0x242   : > { %v1707_v44 = vpop.eup %1706  ;;  %1224 = vst.msk [vmem:[%s2239_s15 + $0x28] sm:$0xff] %vm706_vm1, %v1705_v38  ;;  %v1084_v3 = vadd.f32 %v1046_v35, %v2139_v10  ;;  %1732 = vlog2.f32 %v991_v32 }
 0x243   : > { %v1709_v14 = vpop.eup %1708  ;;  %1132 = vst.msk [vmem:[%s2207_s12 + $0x48] sm:$0xff] %vm706_vm1, %v1100_v33  ;;  %v1173_v12 = vmul.f32 1.442695, %v1100_v33  ;;  %v1115_v4 = vsub.f32 %v2452_v25, %v1083_v52  ;;  %v1024_v60 = vmul.f32 0.6931472, %v1707_v44  ;;  %1734 = vlog2.f32 %v994_v49  ;;  %v2460_v49 = vld [vmem:[#allocation13_spill] sm:$0xff] }
 0x244   : > { %v1711_v30 = vpop.eup %1710  ;;  %v1116_v28 = vsub.f32 %v2453_v61, %v1084_v3  ;;  %v1026_v57 = vmul.f32 0.6931472, %v1709_v14 }
 0x245   : > { %v1713_v54 = vpop.eup %1712  ;;  %1239 = vst.msk [vmem:[%s2239_s15 + $0xa0] sm:$0xff] %vm706_vm1, %v1711_v30  ;;  %1736 = vpow2.f32 %v1173_v12  ;;  %1147 = vst.msk [vmem:[%s2207_s12 + $0xc0] sm:$0xff] %vm706_vm1, %v1115_v4  ;;  %v1203_v10 = vmul.f32 1.442695, %v1115_v4  ;;  %v1073_v39 = vadd.f32 %v1024_v60, %v2155_v1  ;;  %v2455_v1 = vld [vmem:[#allocation8_spill] sm:$0xff] }
 0x246   : > { %v1715_v26 = vpop.eup %1714  ;;  %1240 = vst.msk [vmem:[%s2239_s15 + $0xa8] sm:$0xff] %vm706_vm1, %v1713_v54  ;;  %1148 = vst.msk [vmem:[%s2207_s12 + $0xc8] sm:$0xff] %vm706_vm1, %v1116_v28  ;;  %v1205_v62 = vmul.f32 1.442695, %v1116_v28  ;;  %v1074_v51 = vadd.f32 %v1026_v57, %v2149_v63 }
 0x247   : > { %v1717_v11 = vpop.eup %1716  ;;  %1738 = vpow2.f32 %v1203_v10  ;;  %v1105_v53 = vsub.f32 %v2454_v9, %v1073_v39  ;;  %v1020_v42 = vmul.f32 0.6931472, %v1715_v26 }
 0x248   : > { %v1719_v27 = vpop.eup %1718  ;;  %1740 = vpow2.f32 %v1205_v62  ;;  %v1106_v8 = vsub.f32 %v2455_v1, %v1074_v51  ;;  %v1022_v31 = vmul.f32 0.6931472, %v1717_v11 }
 0x249   : > { %v1721_v7 = vpop.eup %1720  ;;  %1229 = vst.msk [vmem:[%s2239_s15 + $0x50] sm:$0xff] %vm706_vm1, %v1719_v27  ;;  %1137 = vst.msk [vmem:[%s2207_s12 + $0x70] sm:$0xff] %vm706_vm1, %v1105_v53  ;;  %v1183_v0 = vmul.f32 1.442695, %v1105_v53  ;;  %v1071_v63 = vadd.f32 %v1020_v42, %v2165_v29  ;;  %v2457_v29 = vld [vmem:[#allocation10_spill] sm:$0xff] }
 0x24a   : > { %v1723_v2 = vpop.eup %1722  ;;  %1230 = vst.msk [vmem:[%s2239_s15 + $0x58] sm:$0xff] %vm706_vm1, %v1721_v7  ;;  %1138 = vst.msk [vmem:[%s2207_s12 + $0x78] sm:$0xff] %vm706_vm1, %v1106_v8  ;;  %v1185_v5 = vmul.f32 1.442695, %v1106_v8  ;;  %v1072_v23 = vadd.f32 %v1022_v31, %v2160_v50 }
 0x24b   : > { %v1725_v46 = vpop.eup %1724  ;;  %1245 = vst.msk [vmem:[%s2239_s15 + $0xd0] sm:$0xff] %vm706_vm1, %v1723_v2  ;;  %1742 = vpow2.f32 %v1183_v0  ;;  %v1103_v13 = vsub.f32 %v2456_v18, %v1071_v63 }
 0x24c   : > { %v1727_v36 = vpop.eup %1726  ;;  %1744 = vpow2.f32 %v1185_v5  ;;  %v1104_v56 = vsub.f32 %v2457_v29, %v1072_v23  ;;  %v1052_v6 = vmul.f32 0.6931472, %v1725_v46 }
 0x24d   : > { %v1729_v21 = vpop.eup %1728  ;;  %1135 = vst.msk [vmem:[%s2207_s12 + $0x60] sm:$0xff] %vm706_vm1, %v1103_v13  ;;  %v1179_v19 = vmul.f32 1.442695, %v1103_v13  ;;  %v1054_v55 = vmul.f32 0.6931472, %v1727_v36 }
 0x24e   : > { %v1731_v22 = vpop.eup %1730  ;;  %1246 = vst.msk [vmem:[%s2239_s15 + $0xd8] sm:$0xff] %vm706_vm1, %v1729_v21  ;;  %1136 = vst.msk [vmem:[%s2207_s12 + $0x68] sm:$0xff] %vm706_vm1, %v1104_v56  ;;  %v1181_v50 = vmul.f32 1.442695, %v1104_v56  ;;  %v1087_v24 = vadd.f32 %v1052_v6, %v2175_v20 }
 0x24f   : > { %v1733_v48 = vpop.eup %1732  ;;  %1227 = vst.msk [vmem:[%s2239_s15 + $0x40] sm:$0xff] %vm706_vm1, %v1731_v22  ;;  %1746 = vpow2.f32 %v1179_v19  ;;  %v1088_v43 = vadd.f32 %v1054_v55, %v2170_v59 }
 0x250   : > { %v1735_v37 = vpop.eup %1734  ;;  %1748 = vpow2.f32 %v1181_v50  ;;  %v1119_v45 = vsub.f32 %v2024_v34, %v1087_v24  ;;  %v1056_v15 = vmul.f32 0.6931472, %v1733_v48 }
 0x251   : > { %v1120_v41 = vsub.f32 %v2458_v47, %v1088_v43  ;;  %v1058_v32 = vmul.f32 0.6931472, %v1735_v37 }
 0x252   : > { %v1737_v40 = vpop.eup %1736  ;;  %1151 = vst.msk [vmem:[%s2207_s12 + $0xe0] sm:$0xff] %vm706_vm1, %v1119_v45  ;;  %v1211_v20 = vmul.f32 1.442695, %v1119_v45  ;;  %v1089_v35 = vadd.f32 %v1056_v15, %v2185_v58 }
 0x253   : > { %1228 = vst.msk [vmem:[%s2239_s15 + $0x48] sm:$0xff] %vm706_vm1, %v1737_v40  ;;  %1152 = vst.msk [vmem:[%s2207_s12 + $0xe8] sm:$0xff] %vm706_vm1, %v1120_v41  ;;  %v1213_v59 = vmul.f32 1.442695, %v1120_v41  ;;  %v1090_v34 = vadd.f32 %v1058_v32, %v2180_v17 }
 0x254   : > { %v1739_v38 = vpop.eup %1738  ;;  %1750 = vpow2.f32 %v1211_v20  ;;  %v1121_v33 = vsub.f32 %v2459_v16, %v1089_v35 }
 0x255   : > { %v1741_v52 = vpop.eup %1740  ;;  %1243 = vst.msk [vmem:[%s2239_s15 + $0xc0] sm:$0xff] %vm706_vm1, %v1739_v38  ;;  %1752 = vpow2.f32 %v1213_v59  ;;  %v1122_v58 = vsub.f32 %v2460_v49, %v1090_v34 }
 0x256   : > { %1244 = vst.msk [vmem:[%s2239_s15 + $0xc8] sm:$0xff] %vm706_vm1, %v1741_v52  ;;  %1153 = vst.msk [vmem:[%s2207_s12 + $0xf0] sm:$0xff] %vm706_vm1, %v1121_v33  ;;  %v1215_v17 = vmul.f32 1.442695, %v1121_v33 }
 0x257   : > { %1154 = vst.msk [vmem:[%s2207_s12 + $0xf8] sm:$0xff] %vm706_vm1, %v1122_v58  ;;  %v1217_v44 = vmul.f32 1.442695, %v1122_v58 }
 0x258   : > { %v1743_v3 = vpop.eup %1742  ;;  %1754 = vpow2.f32 %v1215_v17 }
 0x259   : > { %v1745_v14 = vpop.eup %1744  ;;  %1233 = vst.msk [vmem:[%s2239_s15 + $0x70] sm:$0xff] %vm706_vm1, %v1743_v3  ;;  %1756 = vpow2.f32 %v1217_v44 }
 0x25a   : > { %1234 = vst.msk [vmem:[%s2239_s15 + $0x78] sm:$0xff] %vm706_vm1, %v1745_v14 }
 0x25c   : > { %v1747_v12 = vpop.eup %1746 }
 0x25d   : > { %v1749_v25 = vpop.eup %1748  ;;  %1231 = vst.msk [vmem:[%s2239_s15 + $0x60] sm:$0xff] %vm706_vm1, %v1747_v12 }
 0x25e   : > { %1232 = vst.msk [vmem:[%s2239_s15 + $0x68] sm:$0xff] %vm706_vm1, %v1749_v25 }
 0x261   : > { %v1751_v4 = vpop.eup %1750 }
 0x262   : > { %v1753_v60 = vpop.eup %1752  ;;  %1247 = vst.msk [vmem:[%s2239_s15 + $0xe0] sm:$0xff] %vm706_vm1, %v1751_v4 }
 0x263   : > { %1248 = vst.msk [vmem:[%s2239_s15 + $0xe8] sm:$0xff] %vm706_vm1, %v1753_v60 }
 0x265   : > { %v1755_v30 = vpop.eup %1754 }
 0x266   : > { %v1757_v61 = vpop.eup %1756  ;;  %1249 = vst.msk [vmem:[%s2239_s15 + $0xf0] sm:$0xff] %vm706_vm1, %v1755_v30 }
 0x267   : > { %1250 = vst.msk [vmem:[%s2239_s15 + $0xf8] sm:$0xff] %vm706_vm1, %v1757_v61 }
 0x268 PF: > { %s16_s18 = sadd.s32 1, %s1764_s18  }
 0x269   : > { %p13_p4 = scmp.ge.s32.totalorder %s16_s18, 4  }
 0x26b   :  { %15 = sbr.rel (!%p13_p4) target bundleno = 1 (0x1), region = 81 }

</bundles_post_ra>
